<compile_context>
chip_gen: v5e
topology: v5e:2x2
jax: 0.10.0
libtpu: 0.0.40
codegen_flags: <defaults>
</compile_context>

<pallas_src>
import functools

import jax
import jax.numpy as jnp
from jax.experimental import pallas as pl
from jax.experimental.pallas import tpu as pltpu


def _round_up(x, m):
    return ((x + m - 1) // m) * m


def _motor_adaptor_kernel(x_ref, idx_ref, wcat_ref, b_ref, o_ref, *,
                          num_robots, ad_pad, action_dim):
    # x_ref    : (TB, MC)             action rows for this batch tile
    # idx_ref  : (TB, 1) int32        robot id per row (padded rows carry -1)
    # wcat_ref : (MC, R*AD_pad)       fused weight matrix, resident in VMEM
    # b_ref    : (R, 1, AD_pad)       bias stack, resident in VMEM
    # o_ref    : (TB, AD)
    x = x_ref[...]                                           # (TB, MC)
    rid = idx_ref[...]                                       # (TB, 1)
    tb = x.shape[0]

    # Single wide MXU matmul covering all robots at once.
    y_all = jnp.dot(x, wcat_ref[...],
                    preferred_element_type=jnp.float32)      # (TB, R*AD_pad)

    # Hoisted broadcast of the per-row robot id (one broadcast, R compares).
    rid_b = jnp.broadcast_to(rid, (tb, ad_pad))              # (TB, AD_pad)

    acc = jnp.zeros((tb, ad_pad), jnp.float32)
    for r in range(num_robots):                              # static, R is tiny
        # Static, 128-aligned lane slice of the fused matmul result.
        y_r = y_all[:, r * ad_pad:(r + 1) * ad_pad] + b_ref[r]
        acc = jnp.where(rid_b == r, y_r, acc)

    # Store only the true action_dim lanes (masked vst, 8x fewer write bytes).
    o_ref[...] = acc[:, :action_dim].astype(o_ref.dtype)


def prepare_motor_params(weights, biases):
    """One-time parameter prep (call at init and cache the result).

    weights : (num_robots, motor_channel, action_dim) float32
              (transpose of torch Linear.weight, so the kernel does x @ W)
    biases  : (num_robots, action_dim) float32
    """
    R, MC, AD = weights.shape
    assert biases.shape == (R, AD)
    AD_pad = _round_up(AD, 128)

    w_pad = jnp.pad(weights, ((0, 0), (0, 0), (0, AD_pad - AD)))   # (R, MC, AD_pad)
    # Lane-concatenate the per-robot weights: (MC, R*AD_pad).
    w_cat = jnp.transpose(w_pad, (1, 0, 2)).reshape(MC, R * AD_pad)
    b_pad = jnp.pad(biases, ((0, 0), (0, AD_pad - AD))).reshape(R, 1, AD_pad)

    return {
        "w_cat": w_cat,
        "b": b_pad,
        "num_robots": R,
        "motor_channel": MC,
        "action_dim": AD,
        "ad_pad": AD_pad,
    }


def pns_motor_adaptor(action, robot_idx, params, *, max_tile_b=512):
    """Pallas implementation of PNSMotorAdaptor.forward.

    action    : (B, motor_channel) float32
    robot_idx : (B,) int -- robot index per row; for the scalar-robot_id case
                 pass a constant-filled vector. Must be in [0, num_robots).
    params    : output of prepare_motor_params (built once at init)
    returns   : (B, action_dim) float32
    """
    B, MC = action.shape
    R = params["num_robots"]
    AD = params["action_dim"]
    AD_pad = params["ad_pad"]
    assert MC == params["motor_channel"]

    # Batch tile: multiple of 8 sublanes, at most max_tile_b, and chosen so the
    # grid has >= 2 steps when the batch is big enough (v7x dual-TC split).
    half = _round_up(max(1, -(-B // 2)), 8)          # ceil(B/2) rounded to 8
    TB = max(8, min(_round_up(max_tile_b, 8), half))
    B_pad = _round_up(B, TB)

    if B_pad != B:
        x = jnp.pad(action, ((0, B_pad - B), (0, 0)))
        rid = jnp.pad(robot_idx.astype(jnp.int32), (0, B_pad - B),
                      constant_values=-1)
    else:
        x = action
        rid = robot_idx.astype(jnp.int32)
    rid = rid.reshape(B_pad, 1)

    grid = (B_pad // TB,)

    out = pl.pallas_call(
        functools.partial(_motor_adaptor_kernel,
                          num_robots=R, ad_pad=AD_pad, action_dim=AD),
        out_shape=jax.ShapeDtypeStruct((B_pad, AD), action.dtype),
        grid=grid,
        in_specs=[
            # streamed per-tile inputs
            pl.BlockSpec((TB, MC), lambda i: (i, 0)),
            pl.BlockSpec((TB, 1), lambda i: (i, 0)),
            # resident parameter blocks (constant block index -> fetched once)
            pl.BlockSpec((MC, R * AD_pad), lambda i: (0, 0)),
            pl.BlockSpec((R, 1, AD_pad), lambda i: (0, 0, 0)),
        ],
        out_specs=pl.BlockSpec((TB, AD), lambda i: (i, 0)),
        compiler_params=pltpu.CompilerParams(
            dimension_semantics=("parallel",)),
    )(x, rid, params["w_cat"], params["b"])

    return out if B_pad == B else out[:B]


def _init_params(key, num_robots, motor_channel, action_dim):
    """Deterministic per-robot Linear params (PyTorch-style uniform init)."""
    bound = 1.0 / jnp.sqrt(motor_channel)
    kw, kb = jax.random.split(key)
    # torch Linear weight is (action_dim, motor_channel); store the transpose
    # (motor_channel, action_dim) so the kernel computes x @ W.
    weights = jax.random.uniform(
        kw, (num_robots, motor_channel, action_dim),
        minval=-bound, maxval=bound, dtype=jnp.float32)
    biases = jax.random.uniform(
        kb, (num_robots, action_dim),
        minval=-bound, maxval=bound, dtype=jnp.float32)
    return weights, biases


def _reference(action, robot_idx, weights, biases):
    return jnp.einsum("bm,bma->ba", action, weights[robot_idx]) + biases[robot_idx]


if __name__ == "__main__":
    key = jax.random.PRNGKey(0)
    k_param, k_act, k_idx, k_act2, k_idx2 = jax.random.split(key, 5)

    num_robots = 3
    motor_channel = 32
    action_dim = 16
    batch = 8

    weights, biases = _init_params(k_param, num_robots, motor_channel, action_dim)
    # One-time parameter prep (hoisted out of the per-call path).
    params = prepare_motor_params(weights, biases)

    action = jax.random.normal(k_act, (batch, motor_channel), dtype=jnp.float32)

    # list-of-robot_id case: one robot id per batch element
    robot_idx = jax.random.randint(k_idx, (batch,), 0, num_robots, dtype=jnp.int32)
    out = jax.block_until_ready(pns_motor_adaptor(action, robot_idx, params))
    ref = _reference(action, robot_idx, weights, biases)
    assert out.shape == (batch, action_dim)
    assert jnp.allclose(out, ref, atol=1e-5, rtol=1e-5)

    # single-robot_id case: whole batch through one robot's linear layer
    single_idx = jnp.full((batch,), 1, dtype=jnp.int32)
    out_single = jax.block_until_ready(
        pns_motor_adaptor(action, single_idx, params))
    ref_single = action @ weights[1] + biases[1]
    assert jnp.allclose(out_single, ref_single, atol=1e-5, rtol=1e-5)

    # larger, non-multiple-of-tile batch to exercise tiling + padding path
    # (also exercises the >= 2 grid-step split used for v7x dual-TC).
    batch_big = 200
    action_big = jax.random.normal(k_act2, (batch_big, motor_channel),
                                   dtype=jnp.float32)
    robot_idx_big = jax.random.randint(k_idx2, (batch_big,), 0, num_robots,
                                       dtype=jnp.int32)
    out_big = jax.block_until_ready(
        pns_motor_adaptor(action_big, robot_idx_big, params))
    ref_big = _reference(action_big, robot_idx_big, weights, biases)
    assert out_big.shape == (batch_big, action_dim)
    assert jnp.allclose(out_big, ref_big, atol=1e-5, rtol=1e-5)

    print("KERNEL_OK")
</pallas_src>

<mosaic_0001>
module attributes {stable_mosaic.version = 11 : i64} {
  func.func @_motor_adaptor_kernel(%arg0: i32, %arg1: memref<8x32xf32, #tpu.memory_space<vmem>>, %arg2: memref<8x1xi32, #tpu.memory_space<vmem>>, %arg3: memref<32x384xf32, #tpu.memory_space<vmem>>, %arg4: memref<3x1x128xf32, #tpu.memory_space<vmem>>, %arg5: memref<8x16xf32, #tpu.memory_space<vmem>>) attributes {dimension_semantics = [#tpu.dimension_semantics<parallel>], iteration_bounds = array<i64: 1>, scalar_prefetch = 0 : i64, scratch_operands = 0 : i64, tpu.core_type = #tpu.core_type<tc>, window_params = [{transform_indices = @transform_0, window_bounds = array<i64: 8, 32>}, {transform_indices = @transform_1, window_bounds = array<i64: 8, 1>}, {pipeline_mode = #tpu.pipeline_mode<synchronous>, transform_indices = @transform_2, window_bounds = array<i64: 32, 384>}, {pipeline_mode = #tpu.pipeline_mode<synchronous>, transform_indices = @transform_3, window_bounds = array<i64: 3, 1, 128>}, {transform_indices = @transform_4, window_bounds = array<i64: 8, 16>}]} {
    %c0 = arith.constant 0 : index
    %c0_0 = arith.constant 0 : index
    %0 = vector.load %arg1[%c0, %c0_0] : memref<8x32xf32, #tpu.memory_space<vmem>>, vector<8x32xf32>
    %c0_1 = arith.constant 0 : index
    %c0_2 = arith.constant 0 : index
    %1 = vector.load %arg2[%c0_1, %c0_2] : memref<8x1xi32, #tpu.memory_space<vmem>>, vector<8x1xi32>
    %c0_3 = arith.constant 0 : index
    %c0_4 = arith.constant 0 : index
    %2 = vector.load %arg3[%c0_3, %c0_4] : memref<32x384xf32, #tpu.memory_space<vmem>>, vector<32x384xf32>
    %cst = arith.constant dense<0.000000e+00> : vector<8x384xf32>
    %3 = tpu.matmul %0, %2, %cst {dimension_numbers = #tpu.dot_dimension_numbers<[1], [0], [0], [1], [0, 0, 1, 1], [], []>} : vector<8x32xf32>, vector<32x384xf32>, vector<8x384xf32> -> vector<8x384xf32>
    %4 = vector.shape_cast %1 : vector<8x1xi32> to vector<8x1xi32>
    %5 = vector.broadcast %4 : vector<8x1xi32> to vector<8x128xi32>
    %cst_5 = arith.constant 0.000000e+00 : f32
    %6 = vector.broadcast %cst_5 : f32 to vector<8x128xf32>
    %7 = vector.extract_strided_slice %3 {offsets = [0, 0], sizes = [8, 128], strides = [1, 1]} : vector<8x384xf32> to vector<8x128xf32>
    %c0_6 = arith.constant 0 : index
    %c0_7 = arith.constant 0 : index
    %c0_8 = arith.constant 0 : index
    %8 = vector.load %arg4[%c0_6, %c0_7, %c0_8] : memref<3x1x128xf32, #tpu.memory_space<vmem>>, vector<1x1x128xf32>
    %9 = vector.shape_cast %8 : vector<1x1x128xf32> to vector<1x128xf32>
    %10 = vector.broadcast %9 : vector<1x128xf32> to vector<8x128xf32>
    %11 = arith.addf %7, %10 : vector<8x128xf32>
    %c0_i32 = arith.constant 0 : i32
    %12 = vector.broadcast %c0_i32 : i32 to vector<8x128xi32>
    %13 = arith.cmpi eq, %5, %12 : vector<8x128xi32>
    %14 = arith.select %13, %11, %6 : vector<8x128xi1>, vector<8x128xf32>
    %15 = vector.extract_strided_slice %3 {offsets = [0, 128], sizes = [8, 128], strides = [1, 1]} : vector<8x384xf32> to vector<8x128xf32>
    %c1 = arith.constant 1 : index
    %c0_9 = arith.constant 0 : index
    %c0_10 = arith.constant 0 : index
    %16 = vector.load %arg4[%c1, %c0_9, %c0_10] : memref<3x1x128xf32, #tpu.memory_space<vmem>>, vector<1x1x128xf32>
    %17 = vector.shape_cast %16 : vector<1x1x128xf32> to vector<1x128xf32>
    %18 = vector.broadcast %17 : vector<1x128xf32> to vector<8x128xf32>
    %19 = arith.addf %15, %18 : vector<8x128xf32>
    %c1_i32 = arith.constant 1 : i32
    %20 = vector.broadcast %c1_i32 : i32 to vector<8x128xi32>
    %21 = arith.cmpi eq, %5, %20 : vector<8x128xi32>
    %22 = arith.select %21, %19, %14 : vector<8x128xi1>, vector<8x128xf32>
    %23 = vector.extract_strided_slice %3 {offsets = [0, 256], sizes = [8, 128], strides = [1, 1]} : vector<8x384xf32> to vector<8x128xf32>
    %c2 = arith.constant 2 : index
    %c0_11 = arith.constant 0 : index
    %c0_12 = arith.constant 0 : index
    %24 = vector.load %arg4[%c2, %c0_11, %c0_12] : memref<3x1x128xf32, #tpu.memory_space<vmem>>, vector<1x1x128xf32>
    %25 = vector.shape_cast %24 : vector<1x1x128xf32> to vector<1x128xf32>
    %26 = vector.broadcast %25 : vector<1x128xf32> to vector<8x128xf32>
    %27 = arith.addf %23, %26 : vector<8x128xf32>
    %c2_i32 = arith.constant 2 : i32
    %28 = vector.broadcast %c2_i32 : i32 to vector<8x128xi32>
    %29 = arith.cmpi eq, %5, %28 : vector<8x128xi32>
    %30 = arith.select %29, %27, %22 : vector<8x128xi1>, vector<8x128xf32>
    %31 = vector.extract_strided_slice %30 {offsets = [0, 0], sizes = [8, 16], strides = [1, 1]} : vector<8x128xf32> to vector<8x16xf32>
    %c0_13 = arith.constant 0 : index
    %c0_14 = arith.constant 0 : index
    %32 = vector.load %arg5[%c0_13, %c0_14] : memref<8x16xf32, #tpu.memory_space<vmem>>, vector<8x16xf32>
    tpu.vector_store %arg5[%c0_13, %c0_14], %31 {strides = array<i32>} : memref<8x16xf32, #tpu.memory_space<vmem>>, vector<8x16xf32>,
    return
  }
  func.func @transform_0(%arg0: i32) -> (i32, i32) {
    %c0_i32 = arith.constant 0 : i32
    %c0_i32_0 = arith.constant 0 : i32
    return %arg0, %c0_i32 : i32, i32
  }
  func.func @transform_1(%arg0: i32) -> (i32, i32) {
    %c0_i32 = arith.constant 0 : i32
    %c0_i32_0 = arith.constant 0 : i32
    return %arg0, %c0_i32 : i32, i32
  }
  func.func @transform_2(%arg0: i32) -> (i32, i32) {
    %c0_i32 = arith.constant 0 : i32
    %c0_i32_0 = arith.constant 0 : i32
    %c0_i32_1 = arith.constant 0 : i32
    return %c0_i32, %c0_i32_0 : i32, i32
  }
  func.func @transform_3(%arg0: i32) -> (i32, i32, i32) {
    %c0_i32 = arith.constant 0 : i32
    %c0_i32_0 = arith.constant 0 : i32
    %c0_i32_1 = arith.constant 0 : i32
    %c0_i32_2 = arith.constant 0 : i32
    return %c0_i32, %c0_i32_0, %c0_i32_1 : i32, i32, i32
  }
  func.func @transform_4(%arg0: i32) -> (i32, i32) {
    %c0_i32 = arith.constant 0 : i32
    %c0_i32_0 = arith.constant 0 : i32
    return %arg0, %c0_i32 : i32, i32
  }
}

</mosaic_0001>

<bundles_post_ra>
// kernel: tpu_custom_call.1
= control target key start
LH: loop header
LB: loop body
LE: loop exit
PB: predicated region body
PF: predicated region fallthrough
CT: control target
= control target key end

     0   :  { %9 = vsyncpa [#allocation3], 0  ;;  %s274_s0 = inlined_call_operand.vmem [shape: f32[8,32], index: 0, kind: input, shape index: {}]   ;;  %s275_s1 = inlined_call_operand.vmem [shape: s32[8,1], index: 1, kind: input, shape index: {}]   ;;  %s276_s2 = inlined_call_operand.hbm [shape: f32[32,384], index: 2, kind: input, shape index: {}]   ;;  %s277_s3 = inlined_call_operand.vmem [shape: f32[3,1,128], index: 3, kind: input, shape index: {}]   ;;  %s278_s4 = inlined_call_operand.hbm [shape: f32[8,16], index: 4, kind: output, shape index: {}]  }
   0x1   :  { %10 = vsyncpa [#allocation4], 0  ;;  %s19_s17 = sshll.u32 %s276_s2, 4  ;;  %s223_s18 = smov [#allocation2]   ;;  %s20_s17 = int_to_ptr.hbm [resolvable:$true] %s19_s17 }
   0x2   :  { %s21_s19 = sshll.u32 %s223_s18, 4  ;;  %s224_s20 = smov 384   ;;  %s22_s19 = int_to_ptr.vmem [resolvable:$true] %s21_s19 }
   0x3   :  { %s225_s21 = smov 24  }
   0x4   :  { %27 = dma.hbm_to_vmem [thread:$0]  %s20_s17, 1536, %s22_s19, [#allocation3], %s224_s20, %s224_s20, %s225_s21  }
   0x5   :  { %219 = dma.done.wait [#allocation3], 1536  }
   0x6   :  { %220 = vsyncadd [#allocation3], 4294965760  ;;  %v226_v0 = vmov 0   ;;  %v47_v1 = vld [vmem:[#allocation2 + $0x58] sm:$0xff]  ;;  %v44_v2 = vld [vmem:[#allocation2 + $0x40] sm:$0xff]  ;;  %vm48_vm0 = vcmask 261120  }
   0x7   :  { %167 = vset.pattern.permute.xlu0 %v226_v0  ;;  %v45_v3 = vld [vmem:[#allocation2 + $0x48] sm:$0xff]  ;;  %104 = vmatpush.msra.mxu2 %v47_v1  ;;  %v46_v4 = vld [vmem:[#allocation2 + $0x50] sm:$0xff]  ;;  %v43_v7 = vld [vmem:[#allocation2 + $0x38] sm:$0xff]  ;;  %s227_s29 = smov [#allocation5]   ;;  %s147_s7 = sshll.u32 %s278_s4, 4  ;;  %vm138_vm3 = vcmask 130048   ;;  %s148_s7 = int_to_ptr.hbm [resolvable:$true] %s147_s7 }
   0x8   :  { %64 = vmatpush.msra.mxu0 %v45_v3  ;;  %v42_v5 = vld [vmem:[#allocation2 + $0x30] sm:$0xff]  ;;  %84 = vmatpush.msra.mxu1 %v46_v4  ;;  %v41_v6 = vld [vmem:[#allocation2 + $0x28] sm:$0xff]  ;;  %v39_v8 = vld [vmem:[#allocation2 + $0x18] sm:$0xff]  ;;  %s145_s30 = sshll.u32 %s227_s29, 4  ;;  %s146_s30 = int_to_ptr.vmem [resolvable:$true] %s145_s30 }
   0x9   :  { %105 = vmatpush.msra.mxu2 %v44_v2  ;;  %v38_v9 = vld [vmem:[#allocation2 + $0x10] sm:$0xff]  ;;  %v40_v10 = vld [vmem:[#allocation2 + $0x20] sm:$0xff]  ;;  %v37_v14 = vld [vmem:[#allocation2 + $0x8] sm:$0xff] }
   0xa   :  { %65 = vmatpush.msra.mxu0 %v42_v5  ;;  %85 = vmatpush.msra.mxu1 %v43_v7  ;;  %v36_v11 = vld [vmem:[#allocation2] sm:$0xff] }
   0xb   :  { %v35_v12 = vld [vmem:[%s275_s1] sm:$0xff]  ;;  %106 = vmatpush.msra.mxu2 %v41_v6 }
   0xc   :  { %66 = vmatpush.msra.mxu0 %v39_v8  ;;  %v34_v13 = vld [vmem:[%s274_s0] sm:$0xff]  ;;  %86 = vmatpush.msra.mxu1 %v40_v10 }
   0xd   :  { %113 = vperm.xlu0 %167, %v35_v12   ;;  %107 = vmatpush.msra.mxu2 %v38_v9  ;;  %v168_v15 = vld [vmem:[%s277_s3] ss:$0 sm:$0xff]  ;;  %v169_v17 = vld [vmem:[%s277_s3 + $0x1] ss:$0 sm:$0xff]  ;;  %v170_v23 = vld [vmem:[%s277_s3 + $0x2] ss:$0 sm:$0xff] }
   0xe   :  { %67 = vmatpush.msra.mxu0 %v36_v11  ;;  %159 = vmatmul.msk.f32.vlgmr.msra.gmra.mxu2 %vm48_vm0, %v34_v13 }
   0xf   :  { %157 = vmatmul.msk.f32.vlgmr.msra.gmra.mxu0 %vm48_vm0, %v34_v13  ;;  %87 = vmatpush.msra.mxu1 %v37_v14 }
  0x10   :  { %158 = vmatmul.msk.f32.vlgmr.msra.gmra.mxu1 %vm48_vm0, %v34_v13 }
  0x7f   :  { %v114_v16 = vpop.permute.xlu0 %113 }
  0x80   :  { %vm120_vm1 = vcmp.eq.s32.totalorder %v114_v16, 0  ;;  %vm128_vm2 = vcmp.eq.s32.totalorder %v114_v16, 1  ;;  %vm136_vm4 = vcmp.eq.s32.totalorder %v114_v16, 2 }
  0x8c   :  { %v69_v18 = vpop.f32.mrf.mxu0 }
  0x8d   :  { %v119_v19 = vadd.f32 %v168_v15, %v69_v18  ;;  %v89_v20 = vpop.f32.mrf.mxu1 }
  0x8e   :  { %v127_v22 = vadd.f32 %v169_v17, %v89_v20 }
  0x8f   :  { %v121_v21 = vsel %vm120_vm1, %v119_v19, 0.0 }
  0x90   :  { %v129_v24 = vsel %vm128_vm2, %v127_v22, %v121_v21 }
  0x91   :  { %v109_v25 = vpop.f32.mrf.mxu2 }
  0x92   :  { %v135_v26 = vadd.f32 %v170_v23, %v109_v25 }
  0x94   :  { %v137_v27 = vsel %vm136_vm4, %v135_v26, %v129_v24 }
  0x95   :  { %139 = vst.msk [vmem:[#allocation5] sm:$0xff] %vm138_vm3, %v137_v27 }
  0x96   :  { %150 = dma.vmem_to_hbm [thread:$0]  %s146_s30, 128, %s148_s7, [#allocation4]  }
  0x97   :  { %221 = dma.done.wait [#allocation4], 128  }
  0x98   :  { %222 = vsyncadd [#allocation4], 4294967168 }
  0x99   :  { %155 = vsyncpa [#allocation3], 1 }
  0x9a   :  { %156 = vsyncpa [#allocation4], 1 }

</bundles_post_ra>
